<compile_context>
chip_gen: v7x
topology: tpu7x:2x2x1
jax: 0.10.0
libtpu: 0.0.40
codegen_flags: <defaults>
</compile_context>

<pallas_src>
import functools

import jax
import jax.numpy as jnp
from jax.experimental import pallas as pl
from jax.experimental.pallas import tpu as pltpu


def _round_up(x, m):
    return (x + m - 1) // m * m


def _policy_kernel(x_ref, w1_ref, b1_ref, w2_ref, b2_ref, w3_ref, b3_ref, o_ref):
    # Hoist biases: read once, keep in f32 for the epilogue math.
    b1 = b1_ref[...]
    b2 = b2_ref[...]
    b3 = b3_ref[...]

    # Layer 1: bf16 matmul, f32 accumulation; bias + ReLU in f32.
    h = jnp.dot(x_ref[...], w1_ref[...], preferred_element_type=jnp.float32)
    h = jnp.maximum(h + b1, 0.0)

    # Layer 2.
    h = jnp.dot(h.astype(w2_ref.dtype), w2_ref[...],
                preferred_element_type=jnp.float32)
    h = jnp.maximum(h + b2, 0.0)

    # Means head: w3/b3 were pre-sliced to the first (means) half and zero-padded
    # to a lane-dense 128-wide output, so no in-kernel slicing is needed.
    out = jnp.dot(h.astype(w3_ref.dtype), w3_ref[...],
                  preferred_element_type=jnp.float32) + b3
    o_ref[...] = jnp.tanh(out).astype(o_ref.dtype)


@functools.partial(jax.jit, static_argnames=("batch_tile",))
def state_dependent_policy_forward(states, params, *, batch_tile=256):
    """tanh(means) of the StateDependentPolicy MLP, computed in a Pallas kernel."""
    w1, b1, w2, b2, w3, b3 = params
    B, S = states.shape
    H1 = w1.shape[1]
    H2 = w2.shape[1]
    two_a = w3.shape[1]
    A = two_a // 2
    out_dtype = states.dtype

    # (1) Drop the log_std half of the output layer: only means are used.
    w3_means = w3[:, :A]
    b3_means = b3[:, :A]

    # (2) Lane-dense output: zero-pad the means head to a multiple of 128 columns.
    N = max(128, _round_up(A, 128))
    w3_pad = jnp.zeros((H2, N), w3.dtype).at[:, :A].set(w3_means)
    b3_pad = jnp.zeros((1, N), b3.dtype).at[:, :A].set(b3_means)

    # (3) bf16 weights/inputs for the MXU; biases stay f32 for the f32 epilogue.
    cdt = jnp.bfloat16
    w1c, w2c, w3c = w1.astype(cdt), w2.astype(cdt), w3_pad.astype(cdt)
    b1f, b2f, b3f = (b1.astype(jnp.float32), b2.astype(jnp.float32),
                     b3_pad.astype(jnp.float32))

    # (4) MXU-friendly batch tile with a padding path for arbitrary batch sizes.
    tile = min(_round_up(batch_tile, 8), _round_up(B, 8))
    Bp = _round_up(B, tile)
    x = states.astype(cdt)
    if Bp != B:
        x = jnp.pad(x, ((0, Bp - B), (0, 0)))

    grid = (Bp // tile,)
    full = lambda shape: pl.BlockSpec(shape, lambda i: (0, 0))

    out = pl.pallas_call(
        _policy_kernel,
        out_shape=jax.ShapeDtypeStruct((Bp, N), out_dtype),
        grid_spec=pltpu.PrefetchScalarGridSpec(
            num_scalar_prefetch=0,
            grid=grid,
            in_specs=[
                pl.BlockSpec((tile, S), lambda i: (i, 0)),   # states tile
                full((S, H1)), full((1, H1)),                # layer 1 (bf16 w, f32 b)
                full((H1, H2)), full((1, H2)),               # layer 2
                full((H2, N)), full((1, N)),                 # means head (padded to N)
            ],
            out_specs=pl.BlockSpec((tile, N), lambda i: (i, 0)),
        ),
        compiler_params=pltpu.CompilerParams(
            dimension_semantics=("parallel",)),
    )(x, w1c, b1f, w2c, b2f, w3c, b3f)

    # Strip batch padding and the lane padding of the means head.
    return out[:B, :A]


def init_params(key, state_dim, action_dim, hidden_units=(256, 256)):
    """Deterministic synthetic parameters (PyTorch-Linear-like uniform init)."""
    dims = [state_dim, *hidden_units, 2 * action_dim]
    params = []
    for fan_in, fan_out in zip(dims[:-1], dims[1:]):
        key, kw, kb = jax.random.split(key, 3)
        bound = 1.0 / jnp.sqrt(fan_in)
        w = jax.random.uniform(kw, (fan_in, fan_out), jnp.float32, -bound, bound)
        b = jax.random.uniform(kb, (1, fan_out), jnp.float32, -bound, bound)
        params += [w, b]
    return tuple(params)


def _reference_forward(states, params):
    w1, b1, w2, b2, w3, b3 = params
    h = jnp.maximum(states @ w1 + b1, 0.0)
    h = jnp.maximum(h @ w2 + b2, 0.0)
    out = h @ w3 + b3
    means = out[:, : out.shape[-1] // 2]
    return jnp.tanh(means)


# TODO(synk): sample()/reparameterize (stochastic path) is not part of forward()
# and is intentionally not implemented here.

if __name__ == "__main__":
    key = jax.random.PRNGKey(0)
    k_x, k_p, k_x2 = jax.random.split(key, 3)

    # Small shapes consistent with the module: state_dim=32, action_dim=4,
    # hidden_units=(256, 256), batch=8.
    batch, state_dim, action_dim = 8, 32, 4
    states = jax.random.normal(k_x, (batch, state_dim), jnp.float32)
    params = init_params(k_p, state_dim, action_dim, hidden_units=(256, 256))

    out = state_dependent_policy_forward(states, params)
    out = jax.block_until_ready(out)
    ref = _reference_forward(states, params)
    assert out.shape == (batch, action_dim)
    # bf16 weights/inputs (f32 accumulation) -> relaxed tolerance vs f32 reference.
    assert jnp.allclose(out, ref, atol=5e-2, rtol=5e-2), "mismatch vs reference"

    # Larger batch exercises the MXU-sized tile (256), multi-step grid and padding.
    big_batch = 520  # not a multiple of 256 -> padding path
    states_big = jax.random.normal(k_x2, (big_batch, state_dim), jnp.float32)
    out_big = state_dependent_policy_forward(states_big, params, batch_tile=256)
    out_big = jax.block_until_ready(out_big)
    ref_big = _reference_forward(states_big, params)
    assert out_big.shape == (big_batch, action_dim)
    assert jnp.allclose(out_big, ref_big, atol=5e-2, rtol=5e-2), "mismatch (big batch)"

    print("KERNEL_OK")
</pallas_src>

<mosaic_0001>
module attributes {stable_mosaic.version = 11 : i64} {
  func.func @_policy_kernel(%arg0: i32, %arg1: memref<8x32xbf16, #tpu.memory_space<vmem>>, %arg2: memref<32x256xbf16, #tpu.memory_space<vmem>>, %arg3: memref<1x256xf32, #tpu.memory_space<vmem>>, %arg4: memref<256x256xbf16, #tpu.memory_space<vmem>>, %arg5: memref<1x256xf32, #tpu.memory_space<vmem>>, %arg6: memref<256x128xbf16, #tpu.memory_space<vmem>>, %arg7: memref<1x128xf32, #tpu.memory_space<vmem>>, %arg8: memref<8x128xf32, #tpu.memory_space<vmem>>) attributes {dimension_semantics = [#tpu.dimension_semantics<parallel>], iteration_bounds = array<i64: 1>, scalar_prefetch = 0 : i64, scratch_operands = 0 : i64, tpu.core_type = #tpu.core_type<tc>, window_params = [{transform_indices = @transform_0, window_bounds = array<i64: 8, 32>}, {pipeline_mode = #tpu.pipeline_mode<synchronous>, transform_indices = @transform_1, window_bounds = array<i64: 32, 256>}, {pipeline_mode = #tpu.pipeline_mode<synchronous>, transform_indices = @transform_2, window_bounds = array<i64: 1, 256>}, {pipeline_mode = #tpu.pipeline_mode<synchronous>, transform_indices = @transform_3, window_bounds = array<i64: 256, 256>}, {pipeline_mode = #tpu.pipeline_mode<synchronous>, transform_indices = @transform_4, window_bounds = array<i64: 1, 256>}, {pipeline_mode = #tpu.pipeline_mode<synchronous>, transform_indices = @transform_5, window_bounds = array<i64: 256, 128>}, {pipeline_mode = #tpu.pipeline_mode<synchronous>, transform_indices = @transform_6, window_bounds = array<i64: 1, 128>}, {transform_indices = @transform_7, window_bounds = array<i64: 8, 128>}]} {
    %c0 = arith.constant 0 : index
    %c0_0 = arith.constant 0 : index
    %0 = vector.load %arg3[%c0, %c0_0] : memref<1x256xf32, #tpu.memory_space<vmem>>, vector<1x256xf32>
    %c0_1 = arith.constant 0 : index
    %c0_2 = arith.constant 0 : index
    %1 = vector.load %arg5[%c0_1, %c0_2] : memref<1x256xf32, #tpu.memory_space<vmem>>, vector<1x256xf32>
    %c0_3 = arith.constant 0 : index
    %c0_4 = arith.constant 0 : index
    %2 = vector.load %arg7[%c0_3, %c0_4] : memref<1x128xf32, #tpu.memory_space<vmem>>, vector<1x128xf32>
    %c0_5 = arith.constant 0 : index
    %c0_6 = arith.constant 0 : index
    %3 = vector.load %arg1[%c0_5, %c0_6] : memref<8x32xbf16, #tpu.memory_space<vmem>>, vector<8x32xbf16>
    %c0_7 = arith.constant 0 : index
    %c0_8 = arith.constant 0 : index
    %4 = vector.load %arg2[%c0_7, %c0_8] : memref<32x256xbf16, #tpu.memory_space<vmem>>, vector<32x256xbf16>
    %cst = arith.constant dense<0.000000e+00> : vector<8x256xf32>
    %5 = tpu.matmul %3, %4, %cst {dimension_numbers = #tpu.dot_dimension_numbers<[1], [0], [0], [1], [0, 0, 1, 1], [], []>} : vector<8x32xbf16>, vector<32x256xbf16>, vector<8x256xf32> -> vector<8x256xf32>
    %6 = vector.broadcast %0 : vector<1x256xf32> to vector<8x256xf32>
    %7 = arith.addf %5, %6 : vector<8x256xf32>
    %cst_9 = arith.constant 0.000000e+00 : f32
    %8 = vector.broadcast %cst_9 : f32 to vector<8x256xf32>
    %9 = arith.maximumf %7, %8 : vector<8x256xf32>
    %10 = arith.truncf %9 : vector<8x256xf32> to vector<8x256xbf16>
    %c0_10 = arith.constant 0 : index
    %c0_11 = arith.constant 0 : index
    %11 = vector.load %arg4[%c0_10, %c0_11] : memref<256x256xbf16, #tpu.memory_space<vmem>>, vector<256x256xbf16>
    %cst_12 = arith.constant dense<0.000000e+00> : vector<8x256xf32>
    %12 = tpu.matmul %10, %11, %cst_12 {dimension_numbers = #tpu.dot_dimension_numbers<[1], [0], [0], [1], [0, 0, 1, 1], [], []>} : vector<8x256xbf16>, vector<256x256xbf16>, vector<8x256xf32> -> vector<8x256xf32>
    %13 = vector.broadcast %1 : vector<1x256xf32> to vector<8x256xf32>
    %14 = arith.addf %12, %13 : vector<8x256xf32>
    %cst_13 = arith.constant 0.000000e+00 : f32
    %15 = vector.broadcast %cst_13 : f32 to vector<8x256xf32>
    %16 = arith.maximumf %14, %15 : vector<8x256xf32>
    %17 = arith.truncf %16 : vector<8x256xf32> to vector<8x256xbf16>
    %c0_14 = arith.constant 0 : index
    %c0_15 = arith.constant 0 : index
    %18 = vector.load %arg6[%c0_14, %c0_15] : memref<256x128xbf16, #tpu.memory_space<vmem>>, vector<256x128xbf16>
    %cst_16 = arith.constant dense<0.000000e+00> : vector<8x128xf32>
    %19 = tpu.matmul %17, %18, %cst_16 {dimension_numbers = #tpu.dot_dimension_numbers<[1], [0], [0], [1], [0, 0, 1, 1], [], []>} : vector<8x256xbf16>, vector<256x128xbf16>, vector<8x128xf32> -> vector<8x128xf32>
    %20 = vector.broadcast %2 : vector<1x128xf32> to vector<8x128xf32>
    %21 = arith.addf %19, %20 : vector<8x128xf32>
    %22 = math.tanh %21 : vector<8x128xf32>
    %c0_17 = arith.constant 0 : index
    %c0_18 = arith.constant 0 : index
    %23 = vector.load %arg8[%c0_17, %c0_18] : memref<8x128xf32, #tpu.memory_space<vmem>>, vector<8x128xf32>
    tpu.vector_store %arg8[%c0_17, %c0_18], %22 {strides = array<i32>} : memref<8x128xf32, #tpu.memory_space<vmem>>, vector<8x128xf32>,
    return
  }
  func.func @transform_0(%arg0: i32) -> (i32, i32) {
    %c0_i32 = arith.constant 0 : i32
    %c0_i32_0 = arith.constant 0 : i32
    return %arg0, %c0_i32 : i32, i32
  }
  func.func @transform_1(%arg0: i32) -> (i32, i32) {
    %c0_i32 = arith.constant 0 : i32
    %c0_i32_0 = arith.constant 0 : i32
    %c0_i32_1 = arith.constant 0 : i32
    return %c0_i32, %c0_i32_0 : i32, i32
  }
  func.func @transform_2(%arg0: i32) -> (i32, i32) {
    %c0_i32 = arith.constant 0 : i32
    %c0_i32_0 = arith.constant 0 : i32
    %c0_i32_1 = arith.constant 0 : i32
    return %c0_i32, %c0_i32_0 : i32, i32
  }
  func.func @transform_3(%arg0: i32) -> (i32, i32) {
    %c0_i32 = arith.constant 0 : i32
    %c0_i32_0 = arith.constant 0 : i32
    %c0_i32_1 = arith.constant 0 : i32
    return %c0_i32, %c0_i32_0 : i32, i32
  }
  func.func @transform_4(%arg0: i32) -> (i32, i32) {
    %c0_i32 = arith.constant 0 : i32
    %c0_i32_0 = arith.constant 0 : i32
    %c0_i32_1 = arith.constant 0 : i32
    return %c0_i32, %c0_i32_0 : i32, i32
  }
  func.func @transform_5(%arg0: i32) -> (i32, i32) {
    %c0_i32 = arith.constant 0 : i32
    %c0_i32_0 = arith.constant 0 : i32
    %c0_i32_1 = arith.constant 0 : i32
    return %c0_i32, %c0_i32_0 : i32, i32
  }
  func.func @transform_6(%arg0: i32) -> (i32, i32) {
    %c0_i32 = arith.constant 0 : i32
    %c0_i32_0 = arith.constant 0 : i32
    %c0_i32_1 = arith.constant 0 : i32
    return %c0_i32, %c0_i32_0 : i32, i32
  }
  func.func @transform_7(%arg0: i32) -> (i32, i32) {
    %c0_i32 = arith.constant 0 : i32
    %c0_i32_0 = arith.constant 0 : i32
    return %arg0, %c0_i32 : i32, i32
  }
}

</mosaic_0001>

<bundles_post_ra>
// kernel: state_dependent_policy_forward.1
= control target key start
LH: loop header
LB: loop body
LE: loop exit
PB: predicated region body
PF: predicated region fallthrough
CT: control target
= control target key end

     0   :  { %v692_v1 = vmov 0   ;;  %vm66_vm0 = vcmask 261120   ;;  %v36_v50 = vlaneseq  ;;  %s904_s1 = inlined_call_operand.vmem [shape: bf16[32,256], index: 1, kind: input, shape index: {}]   ;;  %s905_s3 = inlined_call_operand.vmem [shape: bf16[256,256], index: 3, kind: input, shape index: {}]   ;;  %s906_s0 = inlined_call_operand.vmem [shape: bf16[8,32], index: 0, kind: input, shape index: {}]   ;;  %s907_s5 = inlined_call_operand.vmem [shape: bf16[256,128], index: 5, kind: input, shape index: {}]   ;;  %s908_s2 = inlined_call_operand.vmem [shape: f32[1,256], index: 2, kind: input, shape index: {}]   ;;  %s909_s4 = inlined_call_operand.vmem [shape: f32[1,256], index: 4, kind: input, shape index: {}]   ;;  %s910_s6 = inlined_call_operand.vmem [shape: f32[1,128], index: 6, kind: input, shape index: {}]   ;;  %s911_s7 = inlined_call_operand.vmem [shape: f32[8,128], index: 7, kind: output, shape index: {}]  }
   0x1   :  { %v620_v0 = vld [vmem:[%s904_s1 + $0x4] ss:$8 sps:$4 sm:$0xff]   ;;  %102 = vmatprep.mubr.bf16.mxu0 %v692_v1  ;;  %v622_v2 = vld [vmem:[%s904_s1] ss:$8 sps:$4 sm:$0xff]   ;;  %v623_v3 = vld [vmem:[%s904_s1 + $0x14] ss:$8 sps:$4 sm:$0xff]  }
   0x2   :  { %70 = vmatprep.subr.bf16.mxu0 %v620_v0  ;;  %v625_v4 = vld [vmem:[%s904_s1 + $0x10] ss:$8 sps:$4 sm:$0xff]   ;;  %v626_v5 = vld [vmem:[%s905_s3 + $0x4] ss:$8 sps:$4 sm:$0xff]   ;;  %v628_v6 = vld [vmem:[%s905_s3] ss:$8 sps:$4 sm:$0xff]  }
   0x3   :  { %71 = vmatpush1.bf16.msra.mxu0 %v622_v2  ;;  %318 = vmatprep.subr.bf16.mxu1 %v626_v5  ;;  %v629_v7 = vld [vmem:[%s905_s3 + $0x14] ss:$8 sps:$4 sm:$0xff]   ;;  %v30_v8 = vld [vmem:[%s906_s0] sm:$0xf]  ;;  %v631_v9 = vld [vmem:[%s905_s3 + $0x10] ss:$8 sps:$4 sm:$0xff]  }
   0x4   :  { %72 = vmatprep.subr.bf16.mxu0 %v623_v3  ;;  %319 = vmatpush1.bf16.msra.mxu1 %v628_v6  ;;  %v632_v10 = vld [vmem:[%s905_s3 + $0x24] ss:$8 sps:$4 sm:$0xff]   ;;  %v634_v11 = vld [vmem:[%s905_s3 + $0x20] ss:$8 sps:$4 sm:$0xff]   ;;  %v635_v12 = vld [vmem:[%s905_s3 + $0x34] ss:$8 sps:$4 sm:$0xff]  }
   0x5   :  { %320 = vmatprep.subr.bf16.mxu1 %v629_v7  ;;  %v637_v13 = vld [vmem:[%s905_s3 + $0x30] ss:$8 sps:$4 sm:$0xff]   ;;  %v638_v14 = vld [vmem:[%s905_s3 + $0x44] ss:$8 sps:$4 sm:$0xff]   ;;  %v640_v15 = vld [vmem:[%s905_s3 + $0x40] ss:$8 sps:$4 sm:$0xff]  }
   0x6   :  { %v641_v16 = vld [vmem:[%s905_s3 + $0x54] ss:$8 sps:$4 sm:$0xff]   ;;  %v643_v17 = vld [vmem:[%s905_s3 + $0x50] ss:$8 sps:$4 sm:$0xff]   ;;  %v644_v18 = vld [vmem:[%s905_s3 + $0x64] ss:$8 sps:$4 sm:$0xff]  }
   0x7   :  { %73 = vmatpush1.bf16.msra.mxu0 %v625_v4  ;;  %v646_v19 = vld [vmem:[%s905_s3 + $0x60] ss:$8 sps:$4 sm:$0xff]   ;;  %v647_v20 = vld [vmem:[%s905_s3 + $0x74] ss:$8 sps:$4 sm:$0xff]   ;;  %v649_v21 = vld [vmem:[%s905_s3 + $0x70] ss:$8 sps:$4 sm:$0xff]  }
   0x8   :  { %321 = vmatpush1.bf16.msra.mxu1 %v631_v9  ;;  %v650_v22 = vld [vmem:[%s905_s3 + $0x84] ss:$8 sps:$4 sm:$0xff]   ;;  %v652_v23 = vld [vmem:[%s905_s3 + $0x80] ss:$8 sps:$4 sm:$0xff]   ;;  %v653_v24 = vld [vmem:[%s905_s3 + $0x94] ss:$8 sps:$4 sm:$0xff]  }
   0x9   :  { %322 = vmatprep.subr.bf16.mxu1 %v632_v10  ;;  %v655_v25 = vld [vmem:[%s905_s3 + $0x90] ss:$8 sps:$4 sm:$0xff]   ;;  %v656_v26 = vld [vmem:[%s905_s3 + $0xa4] ss:$8 sps:$4 sm:$0xff]   ;;  %v658_v27 = vld [vmem:[%s905_s3 + $0xa0] ss:$8 sps:$4 sm:$0xff]  }
   0xa   :  { %547 = vmatmul.mubr.msk.bf16.vlgmr.msra.gmra.mrb[0].mxu0 %vm66_vm0, %v30_v8  ;;  %v659_v28 = vld [vmem:[%s905_s3 + $0xb4] ss:$8 sps:$4 sm:$0xff]   ;;  %v661_v29 = vld [vmem:[%s905_s3 + $0xb0] ss:$8 sps:$4 sm:$0xff]   ;;  %v662_v30 = vld [vmem:[%s905_s3 + $0xc4] ss:$8 sps:$4 sm:$0xff]  }
   0xb   :  { %v664_v31 = vld [vmem:[%s905_s3 + $0xc0] ss:$8 sps:$4 sm:$0xff]   ;;  %v665_v32 = vld [vmem:[%s905_s3 + $0xd4] ss:$8 sps:$4 sm:$0xff]   ;;  %v667_v33 = vld [vmem:[%s905_s3 + $0xd0] ss:$8 sps:$4 sm:$0xff]  }
   0xc   :  { %323 = vmatpush1.bf16.msra.mxu1 %v634_v11  ;;  %v668_v34 = vld [vmem:[%s905_s3 + $0xe4] ss:$8 sps:$4 sm:$0xff]   ;;  %v670_v35 = vld [vmem:[%s905_s3 + $0xe0] ss:$8 sps:$4 sm:$0xff]   ;;  %v671_v36 = vld [vmem:[%s905_s3 + $0xf4] ss:$8 sps:$4 sm:$0xff]  }
   0xd   :  { %324 = vmatprep.subr.bf16.mxu1 %v635_v12  ;;  %v673_v37 = vld [vmem:[%s905_s3 + $0xf0] ss:$8 sps:$4 sm:$0xff]   ;;  %v674_v38 = vld [vmem:[%s907_s5 + $0x40] sm:$0xff]   ;;  %v676_v40 = vld [vmem:[%s907_s5 + $0x48] sm:$0xff]   ;;  %v37_v51 = vshrl.u32 %v36_v50, 7 }
   0xe   :  { %v675_v39 = vld [vmem:[%s907_s5] sm:$0xff]   ;;  %597 = vmatprep.subr.bf16.mxu0 %v674_v38  ;;  %v677_v41 = vld [vmem:[%s907_s5 + $0x8] sm:$0xff]   ;;  %v678_v42 = vld [vmem:[%s907_s5 + $0x50] sm:$0xff]  }
   0xf   :  { %598 = vmatpush3.bf16.msra.mxu0 %v675_v39  ;;  %v679_v43 = vld [vmem:[%s907_s5 + $0x10] sm:$0xff]   ;;  %v680_v44 = vld [vmem:[%s907_s5 + $0x58] sm:$0xff]   ;;  %v682_v46 = vld [vmem:[%s907_s5 + $0x60] sm:$0xff]   ;;  %v38_v52 = vsub.s32 0, %v37_v51  ;;  %v42_v54 = vsub.s32 1, %v37_v51 }
  0x10   :  { %325 = vmatpush1.bf16.msra.mxu1 %v637_v13  ;;  %599 = vmatprep.subr.bf16.mxu0 %v676_v40  ;;  %v681_v45 = vld [vmem:[%s907_s5 + $0x18] sm:$0xff]   ;;  %v683_v47 = vld [vmem:[%s907_s5 + $0x20] sm:$0xff]   ;;  %v684_v48 = vld [vmem:[%s907_s5 + $0x68] sm:$0xff]  }
  0x11   :  { %326 = vmatprep.subr.bf16.mxu1 %v638_v14  ;;  %v685_v49 = vld [vmem:[%s907_s5 + $0x28] sm:$0xff]   ;;  %v27_v53 = vld [vmem:[%s908_s2] sm:$0x3]  ;;  %v686_v3 = vld [vmem:[%s907_s5 + $0x70] sm:$0xff]  }
  0x12   :  { %v39_v55 = vrot.slane %v27_v53, %v38_v52  ;;  %v43_v56 = vrot.slane %v27_v53, %v42_v54  ;;  %v687_v4 = vld [vmem:[%s907_s5 + $0x30] sm:$0xff]   ;;  %v688_v5 = vld [vmem:[%s907_s5 + $0x78] sm:$0xff]   ;;  %v28_v7 = vld [vmem:[%s909_s4] sm:$0x3] }
  0x13   :  { %600 = vmatpush3.bf16.msra.mxu0 %v677_v41  ;;  %v689_v6 = vld [vmem:[%s907_s5 + $0x38] sm:$0xff]   ;;  %v151_v8 = vrot.slane %v28_v7, %v38_v52  ;;  %v155_v9 = vrot.slane %v28_v7, %v42_v54 }
  0x14   :  { %327 = vmatpush1.bf16.msra.mxu1 %v640_v15  ;;  %601 = vmatprep.subr.bf16.mxu0 %v678_v42 }
  0x15   :  { %328 = vmatprep.subr.bf16.mxu1 %v641_v16 }
  0x17   :  { %602 = vmatpush3.bf16.msra.mxu0 %v679_v43 }
  0x18   :  { %329 = vmatpush1.bf16.msra.mxu1 %v643_v17  ;;  %603 = vmatprep.subr.bf16.mxu0 %v680_v44 }
  0x19   :  { %330 = vmatprep.subr.bf16.mxu1 %v644_v18 }
  0x1b   :  { %604 = vmatpush3.bf16.msra.mxu0 %v681_v45 }
  0x1c   :  { %331 = vmatpush1.bf16.msra.mxu1 %v646_v19  ;;  %605 = vmatprep.subr.bf16.mxu0 %v682_v46 }
  0x1d   :  { %332 = vmatprep.subr.bf16.mxu1 %v647_v20 }
  0x1f   :  { %606 = vmatpush3.bf16.msra.mxu0 %v683_v47 }
  0x20   :  { %333 = vmatpush1.bf16.msra.mxu1 %v649_v21  ;;  %607 = vmatprep.subr.bf16.mxu0 %v684_v48  ;;  %v580_v21 = vld [vmem:[%s910_s6] ss:$0 sm:$0xff] }
  0x21   :  { %334 = vmatprep.subr.bf16.mxu1 %v650_v22 }
  0x23   :  { %608 = vmatpush3.bf16.msra.mxu0 %v685_v49 }
  0x24   :  { %335 = vmatpush1.bf16.msra.mxu1 %v652_v23  ;;  %609 = vmatprep.subr.bf16.mxu0 %v686_v3 }
  0x25   :  { %336 = vmatprep.subr.bf16.mxu1 %v653_v24 }
  0x27   :  { %610 = vmatpush3.bf16.msra.mxu0 %v687_v4 }
  0x28   :  { %337 = vmatpush1.bf16.msra.mxu1 %v655_v25  ;;  %611 = vmatprep.subr.bf16.mxu0 %v688_v5 }
  0x29   :  { %338 = vmatprep.subr.bf16.mxu1 %v656_v26 }
  0x2b   :  { %612 = vmatpush3.bf16.msra.mxu0 %v689_v6 }
  0x2c   :  { %339 = vmatpush1.bf16.msra.mxu1 %v658_v27 }
  0x2d   :  { %340 = vmatprep.subr.bf16.mxu1 %v659_v28 }
  0x30   :  { %341 = vmatpush1.bf16.msra.mxu1 %v661_v29 }
  0x31   :  { %342 = vmatprep.subr.bf16.mxu1 %v662_v30 }
  0x34   :  { %343 = vmatpush1.bf16.msra.mxu1 %v664_v31 }
  0x35   :  { %344 = vmatprep.subr.bf16.mxu1 %v665_v32 }
  0x38   :  { %345 = vmatpush1.bf16.msra.mxu1 %v667_v33 }
  0x39   :  { %346 = vmatprep.subr.bf16.mxu1 %v668_v34 }
  0x3c   :  { %347 = vmatpush1.bf16.msra.mxu1 %v670_v35 }
  0x3d   :  { %348 = vmatprep.subr.bf16.mxu1 %v671_v36 }
  0x40   :  { %349 = vmatpush1.bf16.msra.mxu1 %v673_v37 }
  0xdd   :  { %v104_v57 = vpop.f32.mrb[0].mxu0 }
  0xde   :  { %v105_v58 = vadd.f32 %v104_v57, %v39_v55  ;;  %v106_v59 = vpop.f32.mrb[1].mxu0 }
  0xdf   :  { %v107_v60 = vadd.f32 %v106_v59, %v43_v56  ;;  %v108_v61 = vpop.f32.mrb[2].mxu0 }
  0xe0   :  { %v111_v62 = vmax.f32 %v105_v58, 0.0  ;;  %v109_v63 = vpop.f32.mrb[3].mxu0 }
  0xe1   :  { %v112_v0 = vmax.f32 %v107_v60, 0.0 }
  0xe2   :  { %v113_v2 = vpack.c.bf16 %v111_v62, %v111_v62 }
  0xe3   :  { %v114_v1 = vpack.c.bf16 %v112_v0, %v112_v0 }
  0xe5   :  { %350 = vmatprep.mubr.bf16.mxu1 %v114_v1 }
  0xe6   :  { %351 = vmatmul.mubr.bf16.vlgmr.msra.gmra.mrb[0].mxu1 %v113_v2 }
 0x1b9   :  { %v352_v10 = vpop.f32.mrb[0].mxu1 }
 0x1ba   :  { %v353_v11 = vadd.f32 %v352_v10, %v151_v8  ;;  %v354_v12 = vpop.f32.mrb[1].mxu1 }
 0x1bb   :  { %v355_v13 = vadd.f32 %v354_v12, %v155_v9  ;;  %v356_v14 = vpop.f32.mrb[2].mxu1 }
 0x1bc   :  { %v359_v15 = vmax.f32 %v353_v11, 0.0  ;;  %v357_v16 = vpop.f32.mrb[3].mxu1 }
 0x1bd   :  { %v360_v17 = vmax.f32 %v355_v13, 0.0 }
 0x1be   :  { %v361_v19 = vpack.c.bf16 %v359_v15, %v359_v15 }
 0x1bf   :  { %v362_v18 = vpack.c.bf16 %v360_v17, %v360_v17 }
 0x1c1   :  { %529 = vmatprep.mubr.bf16.mxu0 %v362_v18 }
 0x1c2   :  { %530 = vmatmul.mubr.bf16.vlgmr.msra.gmra.mrb[4].mxu0 %v361_v19 }
 0x295   :  { %v613_v20 = vpop.f32.mrb[4].mxu0 }
 0x296   :  { %v614_v22 = vpop.f32.mrb[5].mxu0 }
 0x297   :  { %v615_v23 = vadd.f32 %v614_v22, %v613_v20  ;;  %v616_v24 = vpop.f32.mrb[6].mxu0 }
 0x298   :  { %v617_v25 = vpop.f32.mrb[7].mxu0 }
 0x299   :  { %v532_v26 = vadd.f32 %v615_v23, %v580_v21 }
 0x29b   :  { %690 = vtanh.f32 %v532_v26 }
 0x2a5   :  { %v691_v27 = vpop.eup %690 }
 0x2a6   :  { %538 = vst [vmem:[%s911_s7] sm:$0xff] %v691_v27 }

</bundles_post_ra>
